<compile_context>
chip_gen: v7x
topology: tpu7x:2x2x1
jax: 0.10.0
libtpu: 0.0.40
codegen_flags: <defaults>
</compile_context>

<pallas_src>
import functools
import math

import jax
import jax.numpy as jnp
from jax.experimental import pallas as pl
from jax.experimental.pallas import tpu as pltpu


# --------------------------------------------------------------------------
# Small helpers
# --------------------------------------------------------------------------
def _round_up(n, m):
    return ((n + m - 1) // m) * m


def _act(x, nonlinearity):
    return jnp.tanh(x) if nonlinearity == "tanh" else jnp.maximum(x, 0.0)


def _pad2(a, rows, cols):
    """Pad a 2-D array up to (rows, cols); no-op when already that shape."""
    r, c = a.shape
    if r == rows and c == cols:
        return a
    return jnp.zeros((rows, cols), a.dtype).at[:r, :c].set(a)


def _pick_n_block(hid_p):
    """Output-column block (multiple of 128, or the full padded hidden)."""
    if hid_p <= 512:
        return hid_p
    for c in (512, 256, 128):
        if hid_p % c == 0:
            return c
    return hid_p


def _pick_batch_block(b_p, prefer_split=False):
    """Batch-row block (multiple of 8). prefer_split biases toward >=2 blocks
    so the leading 'parallel' axis can use both v7x TensorCores."""
    bm = b_p
    if prefer_split and b_p >= 16 and (b_p // 2) % 8 == 0:
        bm = b_p // 2
    while bm > 256 and bm % 2 == 0 and (bm // 2) % 8 == 0:
        bm //= 2
    return bm


def _compiler_params(semantics, need_bytes):
    # Raise the scoped VMEM limit explicitly once resident weights + stream
    # buffers approach the defaults (16 MiB v5e / 32 MiB v6e,v7x).
    limit = int(min(max(need_bytes + (2 << 20), 32 << 20), 100 << 20))
    return pltpu.CompilerParams(dimension_semantics=semantics,
                                vmem_limit_bytes=limit)


# --------------------------------------------------------------------------
# Kernels
# --------------------------------------------------------------------------
def _cell_kernel(x_ref, h_ref, wx_ref, wh_ref, b_ref, out_ref, *, nonlinearity):
    # Two MXU dots (no fused-K concat needed), f32 accumulation, one VPU add.
    pre = jnp.dot(x_ref[...], wx_ref[...], preferred_element_type=jnp.float32)
    pre = pre + jnp.dot(h_ref[...], wh_ref[...],
                        preferred_element_type=jnp.float32)
    pre = pre + b_ref[...]
    out_ref[...] = _act(pre, nonlinearity).astype(out_ref.dtype)


def _cell_kernel_nohx(x_ref, wx_ref, b_ref, out_ref, *, nonlinearity):
    # hx=None path: hidden matmul skipped entirely (hx would be all zeros).
    pre = jnp.dot(x_ref[...], wx_ref[...], preferred_element_type=jnp.float32)
    pre = pre + b_ref[...]
    out_ref[...] = _act(pre, nonlinearity).astype(out_ref.dtype)


def _seq_kernel(xproj_ref, wh_ref, h0_ref, out_ref, h_scratch, *,
                nonlinearity, tu):
    # Grid = (batch blocks [parallel], time blocks [arbitrary]).
    # Wh^T stays VMEM-resident (constant index_map); only h @ Wh^T is on the
    # serial critical path. TU timesteps per grid step amortize the per-step
    # grid overhead; h is carried in vregs across the unrolled inner loop.
    @pl.when(pl.program_id(1) == 0)
    def _():
        h_scratch[...] = h0_ref[...].astype(jnp.float32)

    wh = wh_ref[...]
    h = h_scratch[...]
    for i in range(tu):                     # static full unroll (tu is small)
        pre = xproj_ref[i] + jnp.dot(h.astype(wh.dtype), wh,
                                     preferred_element_type=jnp.float32)
        h = _act(pre, nonlinearity)
        out_ref[i] = h.astype(out_ref.dtype)
    h_scratch[...] = h


# --------------------------------------------------------------------------
# One-time parameter packing (all layout work hoisted out of per-step path)
# --------------------------------------------------------------------------
def pack_params(w_x2h, b_x2h, w_h2h, b_h2h, dtype=None):
    """Transpose, pad, slab-split and bias-sum the PyTorch-layout params once.

    w_x2h: (hidden, input)   b_x2h: (hidden,)
    w_h2h: (hidden, hidden)  b_h2h: (hidden,)
    Pass dtype=jnp.bfloat16 to pack MXU operands in bf16 (accumulation stays
    f32 in the kernels; bias stays f32).
    """
    hidden, input_size = w_x2h.shape
    dtype = dtype or w_x2h.dtype
    in_p = _round_up(input_size, 128)
    hid_p = _round_up(hidden, 128)

    wx_t = jnp.zeros((in_p, hid_p), dtype).at[:input_size, :hidden].set(
        jnp.transpose(w_x2h).astype(dtype))
    wh_t = jnp.zeros((hid_p, hid_p), dtype).at[:hidden, :hidden].set(
        jnp.transpose(w_h2h).astype(dtype))
    b = jnp.zeros((1, hid_p), jnp.float32).at[0, :hidden].set(
        b_x2h.astype(jnp.float32) + b_h2h.astype(jnp.float32))

    return dict(wx_t=wx_t, wh_t=wh_t, b=b, input_size=input_size,
                hidden=hidden, in_p=in_p, hid_p=hid_p)


# --------------------------------------------------------------------------
# Single-cell forward (matches BasicRNNCell.forward)
# --------------------------------------------------------------------------
def basic_rnn_cell(x, hx, params, nonlinearity="tanh"):
    if nonlinearity not in ("tanh", "relu"):
        raise ValueError("Invalid nonlinearity selected for RNN.")

    B = x.shape[0]
    in_size, hidden = params["input_size"], params["hidden"]
    in_p, hid_p = params["in_p"], params["hid_p"]
    wx_t, wh_t, b = params["wx_t"], params["wh_t"], params["b"]

    b_p = _round_up(max(B, 8), 8)
    bm = _pick_batch_block(b_p)
    bn = _pick_n_block(hid_p)
    grid = (b_p // bm, hid_p // bn)

    x_pad = _pad2(x, b_p, in_p)
    w_item = wx_t.dtype.itemsize
    out_item = x.dtype.itemsize

    if hx is None:
        kernel = functools.partial(_cell_kernel_nohx, nonlinearity=nonlinearity)
        operands = (x_pad, wx_t, b)
        in_specs = [
            pl.BlockSpec((bm, in_p), lambda i, j: (i, 0)),
            pl.BlockSpec((in_p, bn), lambda i, j: (0, j)),
            pl.BlockSpec((1, bn), lambda i, j: (0, j)),
        ]
        need = 2 * (bm * in_p * x_pad.dtype.itemsize + in_p * bn * w_item
                    + bn * 4 + bm * bn * out_item)
    else:
        h_pad = _pad2(hx, b_p, hid_p)
        kernel = functools.partial(_cell_kernel, nonlinearity=nonlinearity)
        operands = (x_pad, h_pad, wx_t, wh_t, b)
        in_specs = [
            pl.BlockSpec((bm, in_p), lambda i, j: (i, 0)),
            pl.BlockSpec((bm, hid_p), lambda i, j: (i, 0)),
            pl.BlockSpec((in_p, bn), lambda i, j: (0, j)),
            pl.BlockSpec((hid_p, bn), lambda i, j: (0, j)),
            pl.BlockSpec((1, bn), lambda i, j: (0, j)),
        ]
        need = 2 * (bm * in_p * x_pad.dtype.itemsize
                    + bm * hid_p * h_pad.dtype.itemsize
                    + (in_p + hid_p) * bn * w_item
                    + bn * 4 + bm * bn * out_item)

    out_p = pl.pallas_call(
        kernel,
        out_shape=jax.ShapeDtypeStruct((b_p, hid_p), x.dtype),
        grid=grid,
        in_specs=in_specs,
        out_specs=pl.BlockSpec((bm, bn), lambda i, j: (i, j)),
        compiler_params=_compiler_params(("parallel", "parallel"), need),
    )(*operands)
    return out_p[:B, :hidden]


# --------------------------------------------------------------------------
# Sequence forward: Wh^T VMEM-resident, time axis blocked, batch parallel
# --------------------------------------------------------------------------
def basic_rnn_sequence(x_seq, h0, params, nonlinearity="tanh"):
    """x_seq: (T, B, input_size) -> all hidden states (T, B, hidden)."""
    if nonlinearity not in ("tanh", "relu"):
        raise ValueError("Invalid nonlinearity selected for RNN.")

    T, B, in_size = x_seq.shape
    hidden = params["hidden"]
    in_p, hid_p = params["in_p"], params["hid_p"]
    wx_t, wh_t, b = params["wx_t"], params["wh_t"], params["b"]

    b_p = _round_up(max(B, 8), 8)
    bm = _pick_batch_block(b_p, prefer_split=True)   # leading "parallel" axis
    tu = min(T, 8)                                   # timesteps per grid step
    nt = pl.cdiv(T, tu)
    T_p = nt * tu

    # Hoist the input projection for ALL timesteps out of the recurrence:
    # one big (T*B, in) @ (in, hid) matmul, bias folded in, kept in f32.
    # TODO(synk): for v5e-class HBM, optionally fold x@Wx into the kernel
    # (keep Wx^T resident too) to avoid the f32 xproj HBM round-trip.
    if B == b_p and in_size == in_p:
        x_pad = x_seq
    else:
        x_pad = jnp.zeros((T, b_p, in_p), x_seq.dtype).at[:, :B, :in_size].set(x_seq)
    xproj = jnp.einsum("tbi,ih->tbh", x_pad, wx_t,
                       preferred_element_type=jnp.float32) + b
    if T_p != T:
        xproj = jnp.zeros((T_p, b_p, hid_p), jnp.float32).at[:T].set(xproj)

    if h0 is None:
        h0_pad = jnp.zeros((b_p, hid_p), jnp.float32)
    else:
        h0_pad = _pad2(h0, b_p, hid_p)

    kernel = functools.partial(_seq_kernel, nonlinearity=nonlinearity, tu=tu)
    w_item = wh_t.dtype.itemsize
    out_item = x_seq.dtype.itemsize
    need = (2 * hid_p * hid_p * w_item                 # resident Wh^T
            + 2 * bm * hid_p * h0_pad.dtype.itemsize   # resident h0 block
            + 2 * tu * bm * hid_p * (4 + out_item)     # streamed xproj + out
            + bm * hid_p * 4)                          # carried-h scratch

    out = pl.pallas_call(
        kernel,
        out_shape=jax.ShapeDtypeStruct((T_p, b_p, hid_p), x_seq.dtype),
        grid_spec=pltpu.PrefetchScalarGridSpec(
            num_scalar_prefetch=0,
            grid=(b_p // bm, nt),
            in_specs=[
                pl.BlockSpec((tu, bm, hid_p), lambda i, t: (t, i, 0)),  # xproj stream
                pl.BlockSpec((hid_p, hid_p), lambda i, t: (0, 0)),      # Wh^T resident
                pl.BlockSpec((bm, hid_p), lambda i, t: (i, 0)),         # h0 per batch blk
            ],
            out_specs=pl.BlockSpec((tu, bm, hid_p), lambda i, t: (t, i, 0)),
            scratch_shapes=[pltpu.VMEM((bm, hid_p), jnp.float32)],      # carried h
        ),
        compiler_params=_compiler_params(("parallel", "arbitrary"), need),
    )(xproj, wh_t, h0_pad)
    return out[:T, :B, :hidden]


# --------------------------------------------------------------------------
# Deterministic init matching reset_parameters()
# --------------------------------------------------------------------------
def init_params(key, input_size, hidden_size, dtype=jnp.float32):
    std = 1.0 / math.sqrt(hidden_size)
    k1, k2, k3, k4 = jax.random.split(key, 4)
    w_x2h = jax.random.uniform(k1, (hidden_size, input_size), dtype, -std, std)
    b_x2h = jax.random.uniform(k2, (hidden_size,), dtype, -std, std)
    w_h2h = jax.random.uniform(k3, (hidden_size, hidden_size), dtype, -std, std)
    b_h2h = jax.random.uniform(k4, (hidden_size,), dtype, -std, std)
    return w_x2h, b_x2h, w_h2h, b_h2h


if __name__ == "__main__":
    batch = 8
    input_size = 16
    hidden_size = 32
    seq_len = 8

    key = jax.random.PRNGKey(0)
    kp, kx, kh, ks = jax.random.split(key, 4)

    w_x2h, b_x2h, w_h2h, b_h2h = init_params(kp, input_size, hidden_size)
    params = pack_params(w_x2h, b_x2h, w_h2h, b_h2h)   # one-time layout work

    x = jax.random.normal(kx, (batch, input_size), jnp.float32)
    hx = jax.random.normal(kh, (batch, hidden_size), jnp.float32)
    x_seq = jax.random.normal(ks, (seq_len, batch, input_size), jnp.float32)

    # Single cell with explicit hx (two-dot kernel, no concat).
    hy = jax.block_until_ready(basic_rnn_cell(x, hx, params, "tanh"))
    hy_relu = jax.block_until_ready(basic_rnn_cell(x, hx, params, "relu"))

    # hx=None path: hidden matmul skipped entirely.
    hy0 = jax.block_until_ready(basic_rnn_cell(x, None, params, "tanh"))

    # Sequence form: Wh^T resident across T, time-blocked recurrence.
    hs = jax.block_until_ready(basic_rnn_sequence(x_seq, hx, params, "tanh"))

    # Pure-JAX references.
    ref_pre = x @ w_x2h.T + b_x2h + hx @ w_h2h.T + b_h2h
    ref = jnp.tanh(ref_pre)
    ref_relu = jnp.maximum(ref_pre, 0.0)
    ref0 = jnp.tanh(x @ w_x2h.T + b_x2h + b_h2h)

    def step(h, xt):
        h_new = jnp.tanh(xt @ w_x2h.T + b_x2h + h @ w_h2h.T + b_h2h)
        return h_new, h_new
    _, ref_seq = jax.lax.scan(step, hx, x_seq)

    assert hy.shape == (batch, hidden_size) and hy.dtype == jnp.float32
    assert jnp.allclose(hy, ref, atol=1e-5, rtol=1e-5)
    assert jnp.allclose(hy_relu, ref_relu, atol=1e-5, rtol=1e-5)
    assert jnp.allclose(hy0, ref0, atol=1e-5, rtol=1e-5)
    assert hs.shape == (seq_len, batch, hidden_size)
    assert jnp.allclose(hs, ref_seq, atol=1e-4, rtol=1e-4)

    print("KERNEL_OK")
</pallas_src>

<mosaic_0001>
module attributes {stable_mosaic.version = 11 : i64} {
  func.func @_cell_kernel(%arg0: i32, %arg1: i32, %arg2: memref<8x128xf32, #tpu.memory_space<vmem>>, %arg3: memref<8x128xf32, #tpu.memory_space<vmem>>, %arg4: memref<128x128xf32, #tpu.memory_space<vmem>>, %arg5: memref<128x128xf32, #tpu.memory_space<vmem>>, %arg6: memref<1x128xf32, #tpu.memory_space<vmem>>, %arg7: memref<8x128xf32, #tpu.memory_space<vmem>>) attributes {dimension_semantics = [#tpu.dimension_semantics<parallel>, #tpu.dimension_semantics<parallel>], iteration_bounds = array<i64: 1, 1>, scalar_prefetch = 0 : i64, scratch_operands = 0 : i64, tpu.core_type = #tpu.core_type<tc>, window_params = [{transform_indices = @transform_0, window_bounds = array<i64: 8, 128>}, {transform_indices = @transform_1, window_bounds = array<i64: 8, 128>}, {transform_indices = @transform_2, window_bounds = array<i64: 128, 128>}, {transform_indices = @transform_3, window_bounds = array<i64: 128, 128>}, {transform_indices = @transform_4, window_bounds = array<i64: 1, 128>}, {transform_indices = @transform_5, window_bounds = array<i64: 8, 128>}]} {
    %c0 = arith.constant 0 : index
    %c0_0 = arith.constant 0 : index
    %0 = vector.load %arg2[%c0, %c0_0] : memref<8x128xf32, #tpu.memory_space<vmem>>, vector<8x128xf32>
    %c0_1 = arith.constant 0 : index
    %c0_2 = arith.constant 0 : index
    %1 = vector.load %arg4[%c0_1, %c0_2] : memref<128x128xf32, #tpu.memory_space<vmem>>, vector<128x128xf32>
    %cst = arith.constant dense<0.000000e+00> : vector<8x128xf32>
    %2 = tpu.matmul %0, %1, %cst {dimension_numbers = #tpu.dot_dimension_numbers<[1], [0], [0], [1], [0, 0, 1, 1], [], []>} : vector<8x128xf32>, vector<128x128xf32>, vector<8x128xf32> -> vector<8x128xf32>
    %c0_3 = arith.constant 0 : index
    %c0_4 = arith.constant 0 : index
    %3 = vector.load %arg3[%c0_3, %c0_4] : memref<8x128xf32, #tpu.memory_space<vmem>>, vector<8x128xf32>
    %c0_5 = arith.constant 0 : index
    %c0_6 = arith.constant 0 : index
    %4 = vector.load %arg5[%c0_5, %c0_6] : memref<128x128xf32, #tpu.memory_space<vmem>>, vector<128x128xf32>
    %cst_7 = arith.constant dense<0.000000e+00> : vector<8x128xf32>
    %5 = tpu.matmul %3, %4, %cst_7 {dimension_numbers = #tpu.dot_dimension_numbers<[1], [0], [0], [1], [0, 0, 1, 1], [], []>} : vector<8x128xf32>, vector<128x128xf32>, vector<8x128xf32> -> vector<8x128xf32>
    %6 = arith.addf %2, %5 : vector<8x128xf32>
    %c0_8 = arith.constant 0 : index
    %c0_9 = arith.constant 0 : index
    %7 = vector.load %arg6[%c0_8, %c0_9] : memref<1x128xf32, #tpu.memory_space<vmem>>, vector<1x128xf32>
    %8 = vector.broadcast %7 : vector<1x128xf32> to vector<8x128xf32>
    %9 = arith.addf %6, %8 : vector<8x128xf32>
    %10 = math.tanh %9 : vector<8x128xf32>
    %c0_10 = arith.constant 0 : index
    %c0_11 = arith.constant 0 : index
    %11 = vector.load %arg7[%c0_10, %c0_11] : memref<8x128xf32, #tpu.memory_space<vmem>>, vector<8x128xf32>
    tpu.vector_store %arg7[%c0_10, %c0_11], %10 {strides = array<i32>} : memref<8x128xf32, #tpu.memory_space<vmem>>, vector<8x128xf32>,
    return
  }
  func.func @transform_0(%arg0: i32, %arg1: i32) -> (i32, i32) {
    %c0_i32 = arith.constant 0 : i32
    %c0_i32_0 = arith.constant 0 : i32
    return %arg0, %c0_i32 : i32, i32
  }
  func.func @transform_1(%arg0: i32, %arg1: i32) -> (i32, i32) {
    %c0_i32 = arith.constant 0 : i32
    %c0_i32_0 = arith.constant 0 : i32
    return %arg0, %c0_i32 : i32, i32
  }
  func.func @transform_2(%arg0: i32, %arg1: i32) -> (i32, i32) {
    %c0_i32 = arith.constant 0 : i32
    %c0_i32_0 = arith.constant 0 : i32
    return %c0_i32, %arg1 : i32, i32
  }
  func.func @transform_3(%arg0: i32, %arg1: i32) -> (i32, i32) {
    %c0_i32 = arith.constant 0 : i32
    %c0_i32_0 = arith.constant 0 : i32
    return %c0_i32, %arg1 : i32, i32
  }
  func.func @transform_4(%arg0: i32, %arg1: i32) -> (i32, i32) {
    %c0_i32 = arith.constant 0 : i32
    %c0_i32_0 = arith.constant 0 : i32
    return %c0_i32, %arg1 : i32, i32
  }
  func.func @transform_5(%arg0: i32, %arg1: i32) -> (i32, i32) {
    %c0_i32 = arith.constant 0 : i32
    return %arg0, %arg1 : i32, i32
  }
}

</mosaic_0001>

<bundles_post_ra>
// kernel: tpu_custom_call.1
= control target key start
LH: loop header
LB: loop body
LE: loop exit
PB: predicated region body
PF: predicated region fallthrough
CT: control target
= control target key end

     0   :  { %10 = vsyncpa [#allocation3], 0  ;;  %s675_s0 = inlined_call_operand.hbm [shape: f32[8,128], index: 0, kind: input, shape index: {}]   ;;  %s676_s1 = inlined_call_operand.hbm [shape: f32[8,128], index: 1, kind: input, shape index: {}]   ;;  %s677_s2 = inlined_call_operand.hbm [shape: f32[128,128], index: 2, kind: input, shape index: {}]   ;;  %s678_s3 = inlined_call_operand.hbm [shape: f32[128,128], index: 3, kind: input, shape index: {}]   ;;  %s679_s4 = inlined_call_operand.vmem [shape: f32[1,128], index: 4, kind: input, shape index: {}]   ;;  %s680_s5 = inlined_call_operand.hbm [shape: f32[8,128], index: 5, kind: output, shape index: {}]  }
   0x1   :  { %11 = vsyncpa [#allocation6], 0 }
   0x2   :  { %12 = vsyncpa [#allocation9], 0 }
   0x3   :  { %13 = vsyncpa [#allocation4], 0  ;;  %s556_s18 = smov [#allocation5]   ;;  %s557_s20 = smov [#allocation2]  }
   0x4   :  { %s30_s19 = sshll.u32 %s556_s18, 4  ;;  %s20_s21 = sshll.u32 %s557_s20, 4  ;;  %s31_s19 = int_to_ptr.vmem [resolvable:$true] %s30_s19  ;;  %s21_s21 = int_to_ptr.vmem [resolvable:$true] %s20_s21 }
   0x5   :  { %s438_s24 = scalar_lea.hbm %s676_s1, 128 }
   0x6   :  { %p439_p0 = scmp.ne.s32.totalorder %s676_s1, %s438_s24  ;;  %p442_p1 = scmp.lt.u32.totalorder %s438_s24, %s676_s1 }
   0x8   :  { %p444_p2 = pnand %p442_p1, %p439_p0 }
   0xa   :  { %447 = shalt.err (!%p444_p2)
}
   0xb   :  { %s448_s29 = scalar_lea.vmem %s31_s19, 128  ;;  %p453_p4 = scmp.lt.s32.totalorder %s31_s19, %s31_s19 }
   0xc   :  { %p449_p3 = scmp.ne.s32.totalorder %s31_s19, %s448_s29  ;;  %p454_p5 = scmp.lt.s32.totalorder %s448_s29, %s448_s29 }
   0xe   :  { %p455_p6 = por %p454_p5, %p453_p4 }
  0x10   :  { %p456_p7 = pnand %p455_p6, %p449_p3 }
  0x12   :  { %459 = shalt.err (!%p456_p7)
}
  0x13   :  { %33 = dma.hbm_to_vmem [thread:$0]  %s676_s1, 128, %s31_s19, [#allocation6]  }
  0x14   :  { %s460_s9 = scalar_lea.hbm %s675_s0, 128 }
  0x15   :  { %p461_p8 = scmp.ne.s32.totalorder %s675_s0, %s460_s9  ;;  %p464_p9 = scmp.lt.u32.totalorder %s460_s9, %s675_s0 }
  0x17   :  { %p466_p10 = pnand %p464_p9, %p461_p8 }
  0x19   :  { %469 = shalt.err (!%p466_p10)
}
  0x1a   :  { %s470_s14 = scalar_lea.vmem %s21_s21, 128  ;;  %p475_p12 = scmp.lt.s32.totalorder %s21_s21, %s21_s21 }
  0x1b   :  { %p471_p11 = scmp.ne.s32.totalorder %s21_s21, %s470_s14  ;;  %p476_p13 = scmp.lt.s32.totalorder %s470_s14, %s470_s14 }
  0x1d   :  { %p477_p0 = por %p476_p13, %p475_p12 }
  0x1f   :  { %p478_p1 = pnand %p477_p0, %p471_p11 }
  0x21   :  { %481 = shalt.err (!%p478_p1)
}
  0x22   :  { %23 = dma.hbm_to_vmem [thread:$0]  %s675_s0, 128, %s21_s21, [#allocation3]  }
  0x23   :  { %s558_s16 = smov [#allocation7]   ;;  %s482_s20 = scalar_lea.hbm %s677_s2, 2048 }
  0x24   :  { %s39_s17 = sshll.u32 %s558_s16, 4  ;;  %p483_p2 = scmp.ne.s32.totalorder %s677_s2, %s482_s20  ;;  %s40_s17 = int_to_ptr.vmem [resolvable:$true] %s39_s17 }
  0x25   :  { %p486_p3 = scmp.lt.u32.totalorder %s482_s20, %s677_s2 }
  0x27   :  { %p488_p4 = pnand %p486_p3, %p483_p2 }
  0x29   :  { %491 = shalt.err (!%p488_p4)
}
  0x2a   :  { %s492_s26 = scalar_lea.vmem %s40_s17, 2048  ;;  %p497_p6 = scmp.lt.s32.totalorder %s40_s17, %s40_s17 }
  0x2b   :  { %p493_p5 = scmp.ne.s32.totalorder %s40_s17, %s492_s26  ;;  %p498_p7 = scmp.lt.s32.totalorder %s492_s26, %s492_s26 }
  0x2d   :  { %p499_p8 = por %p498_p7, %p497_p6 }
  0x2f   :  { %p500_p9 = pnand %p499_p8, %p493_p5 }
  0x31   :  { %503 = shalt.err (!%p500_p9)
}
  0x32   :  { %s559_s0 = smov 128   ;;  %s560_s21 = smov 8  }
  0x33   :  { %45 = dma.hbm_to_vmem [thread:$0]  %s677_s2, 2048, %s40_s17, [#allocation6], %s559_s0, %s559_s0, %s560_s21  }
  0x34   :  { %s561_s29 = smov [#allocation8]   ;;  %s504_s8 = scalar_lea.hbm %s678_s3, 2048 }
  0x35   :  { %s51_s30 = sshll.u32 %s561_s29, 4  ;;  %p505_p10 = scmp.ne.s32.totalorder %s678_s3, %s504_s8  ;;  %s52_s30 = int_to_ptr.vmem [resolvable:$true] %s51_s30 }
  0x36   :  { %p508_p11 = scmp.lt.u32.totalorder %s504_s8, %s678_s3 }
  0x38   :  { %p510_p12 = pnand %p508_p11, %p505_p10 }
  0x3a   :  { %513 = shalt.err (!%p510_p12)
}
  0x3b   :  { %s514_s13 = scalar_lea.vmem %s52_s30, 2048  ;;  %p519_p0 = scmp.lt.s32.totalorder %s52_s30, %s52_s30 }
  0x3c   :  { %p515_p13 = scmp.ne.s32.totalorder %s52_s30, %s514_s13  ;;  %p520_p1 = scmp.lt.s32.totalorder %s514_s13, %s514_s13 }
  0x3e   :  { %p521_p2 = por %p520_p1, %p519_p0 }
  0x40   :  { %p522_p3 = pnand %p521_p2, %p515_p13 }
  0x42   :  { %525 = shalt.err (!%p522_p3)
}
  0x43   :  { %57 = dma.hbm_to_vmem [thread:$0]  %s678_s3, 2048, %s52_s30, [#allocation9], %s559_s0, %s559_s0, %s560_s21  }
  0x44   :  { %548 = dma.done.wait [#allocation3], 128  }
  0x45   :  { %549 = vsyncadd [#allocation3], 4294967168 }
  0x46   :  { %550 = dma.done.wait [#allocation6], 2176  }
  0x47   :  { %551 = vsyncadd [#allocation6], 4294965120 }
  0x48   :  { %552 = dma.done.wait [#allocation9], 2048  }
  0x49   :  { %553 = vsyncadd [#allocation9], 4294965248  ;;  %v562_v0 = vmov 0.0|0.0   ;;  %vm563_vm0 = vmmov 0   ;;  %v564_v1 = vmov 0.0   ;;  %v90_v2 = vld [vmem:[#allocation8] sm:$0xff] }
  0x4a   :  { %378 = vmatprep.subr.bf16.mxu0 %v562_v0  ;;  %402 = vmatprep.subr.bf16.mxu1 %v562_v0  ;;  %v91_v3 = vld [vmem:[#allocation8 + $0x8] sm:$0xff]  ;;  %v73_v4 = vld [vmem:[#allocation7] sm:$0xff]  ;;  %v92_v7 = vld [vmem:[#allocation8 + $0x10] sm:$0xff]  ;;  %s565_s15 = smov [#allocation10]  }
  0x4b   :  { %340 = vmatprep.mubr.msk.f32.mxu0 %vm563_vm0, %v564_v1  ;;  %375 = vmatprep.mubr.msk.f32.mxu1 %vm563_vm0, %v564_v1  ;;  %v379_v5 = vpack.c.bf16 %v91_v3, %v90_v2  ;;  %v74_v6 = vld [vmem:[#allocation7 + $0x8] sm:$0xff]  ;;  %v93_v8 = vld [vmem:[#allocation8 + $0x18] sm:$0xff]  ;;  %v75_v10 = vld [vmem:[#allocation7 + $0x10] sm:$0xff]  ;;  %s262_s16 = sshll.u32 %s565_s15, 4  ;;  %s263_s16 = int_to_ptr.vmem [resolvable:$true] %s262_s16 }
  0x4c   :  { %v403_v9 = vpack.c.bf16 %v74_v6, %v73_v4  ;;  %v76_v11 = vld [vmem:[#allocation7 + $0x18] sm:$0xff]  ;;  %v382_v12 = vpack.c.bf16 %v93_v8, %v92_v7  ;;  %v94_v14 = vld [vmem:[#allocation8 + $0x20] sm:$0xff]  ;;  %v95_v15 = vld [vmem:[#allocation8 + $0x28] sm:$0xff]  ;;  %s526_s17 = scalar_lea.vmem %s263_s16, 128  ;;  %p531_p5 = scmp.lt.s32.totalorder %s263_s16, %s263_s16 }
  0x4d   :  { %380 = vmatpush3.bf16.msra.mxu0 %v379_v5  ;;  %v406_v13 = vpack.c.bf16 %v76_v11, %v75_v10  ;;  %v77_v16 = vld [vmem:[#allocation7 + $0x20] sm:$0xff]  ;;  %v78_v17 = vld [vmem:[#allocation7 + $0x28] sm:$0xff]  ;;  %v385_v18 = vpack.c.bf16 %v95_v15, %v94_v14  ;;  %v96_v20 = vld [vmem:[#allocation8 + $0x30] sm:$0xff]  ;;  %p527_p4 = scmp.ne.s32.totalorder %s263_s16, %s526_s17  ;;  %p532_p6 = scmp.lt.s32.totalorder %s526_s17, %s526_s17 }
  0x4e   :  { %404 = vmatpush3.bf16.msra.mxu1 %v403_v9  ;;  %381 = vmatprep.subr.bf16.mxu0 %v562_v0  ;;  %v409_v19 = vpack.c.bf16 %v78_v17, %v77_v16  ;;  %v97_v21 = vld [vmem:[#allocation8 + $0x38] sm:$0xff]  ;;  %v79_v22 = vld [vmem:[#allocation7 + $0x30] sm:$0xff]  ;;  %v98_v26 = vld [vmem:[#allocation8 + $0x40] sm:$0xff] }
  0x4f   :  { %405 = vmatprep.subr.bf16.mxu1 %v562_v0  ;;  %v80_v23 = vld [vmem:[#allocation7 + $0x38] sm:$0xff]  ;;  %v388_v24 = vpack.c.bf16 %v97_v21, %v96_v20  ;;  %v99_v27 = vld [vmem:[#allocation8 + $0x48] sm:$0xff]  ;;  %v81_v28 = vld [vmem:[#allocation7 + $0x40] sm:$0xff]  ;;  %p533_p7 = por %p532_p6, %p531_p5 }
  0x50   :  { %v412_v25 = vpack.c.bf16 %v80_v23, %v79_v22  ;;  %v82_v29 = vld [vmem:[#allocation7 + $0x48] sm:$0xff]  ;;  %v391_v30 = vpack.c.bf16 %v99_v27, %v98_v26  ;;  %v100_v32 = vld [vmem:[#allocation8 + $0x50] sm:$0xff]  ;;  %v101_v33 = vld [vmem:[#allocation8 + $0x58] sm:$0xff] }
  0x51   :  { %383 = vmatpush3.bf16.msra.mxu0 %v382_v12  ;;  %v415_v31 = vpack.c.bf16 %v82_v29, %v81_v28  ;;  %v83_v34 = vld [vmem:[#allocation7 + $0x50] sm:$0xff]  ;;  %v84_v35 = vld [vmem:[#allocation7 + $0x58] sm:$0xff]  ;;  %v394_v36 = vpack.c.bf16 %v101_v33, %v100_v32  ;;  %v102_v38 = vld [vmem:[#allocation8 + $0x60] sm:$0xff]  ;;  %p534_p8 = pnand %p533_p7, %p527_p4 }
  0x52   :  { %407 = vmatpush3.bf16.msra.mxu1 %v406_v13  ;;  %384 = vmatprep.subr.bf16.mxu0 %v562_v0  ;;  %v418_v37 = vpack.c.bf16 %v84_v35, %v83_v34  ;;  %v103_v39 = vld [vmem:[#allocation8 + $0x68] sm:$0xff]  ;;  %v85_v40 = vld [vmem:[#allocation7 + $0x60] sm:$0xff]  ;;  %v104_v44 = vld [vmem:[#allocation8 + $0x70] sm:$0xff] }
  0x53   :  { %408 = vmatprep.subr.bf16.mxu1 %v562_v0  ;;  %v86_v41 = vld [vmem:[#allocation7 + $0x68] sm:$0xff]  ;;  %v397_v42 = vpack.c.bf16 %v103_v39, %v102_v38  ;;  %v105_v45 = vld [vmem:[#allocation8 + $0x78] sm:$0xff]  ;;  %v87_v46 = vld [vmem:[#allocation7 + $0x70] sm:$0xff] }
  0x54   :  { %v421_v43 = vpack.c.bf16 %v86_v41, %v85_v40  ;;  %v88_v47 = vld [vmem:[#allocation7 + $0x78] sm:$0xff]  ;;  %v400_v48 = vpack.c.bf16 %v105_v45, %v104_v44  ;;  %v72_v51 = vld [vmem:[#allocation2] sm:$0xff] }
  0x55   :  { %386 = vmatpush3.bf16.msra.mxu0 %v385_v18  ;;  %v424_v49 = vpack.c.bf16 %v88_v47, %v87_v46  ;;  %v89_v50 = vld [vmem:[#allocation5] sm:$0xff]  ;;  %v273_v54 = vld [vmem:[%s679_s4] ss:$0 sm:$0xff] }
  0x56   :  { %410 = vmatpush3.bf16.msra.mxu1 %v409_v19  ;;  %387 = vmatprep.subr.bf16.mxu0 %v562_v0 }
  0x57   :  { %411 = vmatprep.subr.bf16.mxu1 %v562_v0 }
  0x59   :  { %389 = vmatpush3.bf16.msra.mxu0 %v388_v24 }
  0x5a   :  { %413 = vmatpush3.bf16.msra.mxu1 %v412_v25  ;;  %390 = vmatprep.subr.bf16.mxu0 %v562_v0 }
  0x5b   :  { %414 = vmatprep.subr.bf16.mxu1 %v562_v0 }
  0x5d   :  { %392 = vmatpush3.bf16.msra.mxu0 %v391_v30 }
  0x5e   :  { %416 = vmatpush3.bf16.msra.mxu1 %v415_v31  ;;  %393 = vmatprep.subr.bf16.mxu0 %v562_v0 }
  0x5f   :  { %417 = vmatprep.subr.bf16.mxu1 %v562_v0 }
  0x61   :  { %395 = vmatpush3.bf16.msra.mxu0 %v394_v36 }
  0x62   :  { %419 = vmatpush3.bf16.msra.mxu1 %v418_v37  ;;  %396 = vmatprep.subr.bf16.mxu0 %v562_v0 }
  0x63   :  { %420 = vmatprep.subr.bf16.mxu1 %v562_v0 }
  0x65   :  { %398 = vmatpush3.bf16.msra.mxu0 %v397_v42 }
  0x66   :  { %422 = vmatpush3.bf16.msra.mxu1 %v421_v43  ;;  %399 = vmatprep.subr.bf16.mxu0 %v562_v0 }
  0x67   :  { %423 = vmatprep.subr.bf16.mxu1 %v562_v0 }
  0x69   :  { %401 = vmatpush3.bf16.msra.mxu0 %v400_v48 }
  0x6a   :  { %425 = vmatpush3.bf16.msra.mxu1 %v424_v49 }
  0x6c   :  { %341 = vmatmul.mubr.f32.vlgmr.msra.gmra.mrb[0].mxu0 %v89_v50 }
  0x6d   :  { %376 = vmatmul.mubr.f32.vlgmr.msra.gmra.mrb[0].mxu1 %v72_v51 }
 0x13f   :  { %v172_v52 = vpop.f32.mrb[0].mxu0 }
 0x140   :  { %v242_v53 = vpop.f32.mrb[0].mxu1  ;;  %v342_v55 = vpop.f32.mrb[1].mxu0 }
 0x141   :  { %v243_v56 = vadd.f32 %v242_v53, %v172_v52  ;;  %v377_v57 = vpop.f32.mrb[1].mxu1 }
 0x143   :  { %v253_v58 = vadd.f32 %v273_v54, %v243_v56 }
 0x145   :  { %436 = vtanh.f32 %v253_v58 }
 0x14f   :  { %v437_v59 = vpop.eup %436 }
 0x150   :  { %255 = vst [vmem:[#allocation10] sm:$0xff] %v437_v59 }
 0x151   :  { %537 = shalt.err (!%p534_p8)
}
 0x152   :  { %s538_s4 = scalar_lea.hbm %s680_s5, 128 }
 0x153   :  { %p539_p9 = scmp.ne.s32.totalorder %s680_s5, %s538_s4  ;;  %p542_p10 = scmp.lt.u32.totalorder %s538_s4, %s680_s5 }
 0x155   :  { %p544_p11 = pnand %p542_p10, %p539_p9 }
 0x157   :  { %547 = shalt.err (!%p544_p11)
}
 0x158   :  { %265 = dma.vmem_to_hbm [thread:$0]  %s263_s16, 128, %s680_s5, [#allocation4]  }
 0x159   :  { %554 = dma.done.wait [#allocation4], 128  }
 0x15a   :  { %555 = vsyncadd [#allocation4], 4294967168 }
 0x15b   :  { %269 = vsyncpa [#allocation3], 1 }
 0x15c   :  { %270 = vsyncpa [#allocation6], 1 }
 0x15d   :  { %271 = vsyncpa [#allocation9], 1 }
 0x15e   :  { %272 = vsyncpa [#allocation4], 1 }

</bundles_post_ra>
